<compile_context>
chip_gen: v6e
topology: v6e:2x2x1
jax: 0.10.0
libtpu: 0.0.40
codegen_flags: <defaults>
</compile_context>

<pallas_src>
import functools

import jax
import jax.numpy as jnp
from jax.experimental import pallas as pl
from jax.experimental.pallas import tpu as pltpu

KH = KW = 3  # Conv2d kernel_size=3


def _scale_module_kernel(x_ref, fcw_ref, par_ref, out_ref, *, eps, width,
                         out_h, out_w):
    # x_ref:   (B, C, H*W)  VMEM  activations, native dtype (free NCHW reshape)
    # fcw_ref: (1, H*W)     VMEM  fc weight scattered into the HxW frame, 0 elsewhere
    # par_ref: (C*9 + 4,)   SMEM  [conv_w flat (C*9), conv_b, bn_gamma, bn_beta, fc_b]
    # out_ref: (B, 1)       VMEM
    B, C, HW = x_ref.shape
    W = width
    NW = C * KH * KW

    x = x_ref[...].astype(jnp.float32)            # upcast once; no-op for f32 input
    xc = [x[:, c, :] for c in range(C)]           # C channel slabs of (B, HW), hoisted

    # Hoist every scalar SMEM read out of the vector MAC chain.
    w = [par_ref[i] for i in range(NW)]
    # par_ref[NW] is conv_b: it only shifts the batch mean and cancels exactly
    # in training-mode BatchNorm, so the kernel never reads it.
    gamma = par_ref[NW + 1]
    beta = par_ref[NW + 2]
    fc_bias = par_ref[NW + 3]

    # --- Conv2d(C -> 1, k=3, stride=1, valid), lane-dense formulation --------
    # conv[b, i*W+j] = sum_{c,ki,kj} x[b, c, i*W+j + ki*W+kj] * w[c,ki,kj]
    # Per tap: weighted channel sum (VPU), then an XLU roll so lane p picks up
    # the value from lane p+d (np.roll semantics: shift = HW - d).
    acc = None
    for ki in range(KH):
        for kj in range(KW):
            d = ki * W + kj
            t = ki * KW + kj
            tap = xc[0] * w[t]
            for c in range(1, C):
                tap = tap + xc[c] * w[c * KH * KW + t]
            if d:
                tap = pltpu.roll(tap, HW - d, axis=1)
            acc = tap if acc is None else acc + tap
    # acc excludes conv_b; lanes outside the (H-2)x(W-2) valid window hold
    # wrapped (finite) garbage and are masked out of every reduction below.

    # --- Validity mask generated in-kernel (no extra input DMA) --------------
    # f32 floor-division avoids integer div/rem on the VPU; the +0.5 keeps the
    # floor away from integer boundaries despite f32 rounding.
    p = jax.lax.broadcasted_iota(jnp.int32, (1, HW), 1).astype(jnp.float32)
    row = jnp.floor((p + 0.5) * (1.0 / W))
    col = p - row * W
    valid = jnp.logical_and(col < out_w, row < out_h)            # (1, HW)

    # --- BatchNorm2d(1, eps), training-mode stats over the valid taps --------
    # Single fused XLU reduction: concatenate the sum / sum-of-squares operands
    # along the under-used sublane axis and lane-reduce once.
    masked = jnp.where(valid, acc, 0.0)                          # (B, HW)
    cat = jnp.concatenate([masked, masked * masked], axis=0)     # (2B, HW)
    part = jnp.sum(cat, axis=1, keepdims=True)                   # (2B, 1)
    n = float(B * out_h * out_w)
    mean0 = jnp.sum(part[:B, :], keepdims=True) * (1.0 / n)      # (1,1) bias-free mean
    ex2 = jnp.sum(part[B:, :], keepdims=True) * (1.0 / n)        # (1,1)
    # One-pass variance; max(.,0) guards fp cancellation.  Excluding conv_b
    # keeps |mean| small, so the cancellation risk flagged in review stays
    # negligible relative to eps=2e-5.
    var = jnp.maximum(ex2 - mean0 * mean0, 0.0)
    scale = gamma * jax.lax.rsqrt(var + eps)                     # (1,1)
    shift = beta - scale * mean0                                 # conv_b cancels here

    # --- ReLU + flatten + Linear((H-2)*(W-2) -> 1) + Softplus ----------------
    r = jnp.maximum(acc * scale + shift, 0.0)                    # (B, HW), one VPU pass
    fcw = fcw_ref[...]                                           # (1, HW), 0 on invalid lanes
    logits = jnp.sum(r * fcw, axis=1, keepdims=True) + fc_bias   # (B, 1)

    # Softplus (beta=1, threshold=20, as torch.nn.Softplus).
    sp = jnp.where(logits > 20.0, logits,
                   jnp.log(1.0 + jnp.exp(jnp.minimum(logits, 20.0))))
    out_ref[...] = sp.astype(out_ref.dtype)


def prepare_scale_module_params(conv_w, conv_b, bn_gamma, bn_beta, fc_w, fc_b,
                                *, height, width):
    """Build the kernel-side constant operands ONCE, next to the parameters.

    Returns (fc_row, params):
      fc_row: (1, H*W) f32 VMEM operand -- fc weight scattered into the HxW
              frame, exactly zero on cropped/wrapped lanes (this zeroing is
              what keeps garbage lanes out of the logits).
      params: (C*9 + 4,) f32 SMEM operand -- flattened conv weight followed by
              [conv_b, bn_gamma, bn_beta, fc_b].
    """
    C = conv_w.shape[1]
    Ho, Wo = height - KH + 1, width - KW + 1
    assert fc_w.shape == (Ho * Wo,)
    fc_row = jnp.zeros((height, width), jnp.float32)
    fc_row = fc_row.at[:Ho, :Wo].set(fc_w.reshape(Ho, Wo).astype(jnp.float32))
    fc_row = fc_row.reshape(1, height * width)
    params = jnp.concatenate([
        conv_w.reshape(-1).astype(jnp.float32),
        jnp.stack([conv_b, bn_gamma, bn_beta, fc_b]).astype(jnp.float32),
    ])
    return fc_row, params


def scale_module_forward(x, fc_row, params, *, eps=2e-5):
    """x: (B, C, H, W) NCHW, native dtype (bf16 accepted).  Returns (B, 1) f32."""
    B, C, H, W = x.shape
    Ho, Wo = H - KH + 1, W - KW + 1
    x_flat = x.reshape(B, C, H * W)       # free reshape -- no HBM copy / transpose

    kernel = functools.partial(_scale_module_kernel, eps=eps, width=W,
                               out_h=Ho, out_w=Wo)
    return pl.pallas_call(
        kernel,
        out_shape=jax.ShapeDtypeStruct((B, 1), jnp.float32),
        in_specs=[
            pl.BlockSpec(memory_space=pltpu.MemorySpace.VMEM),   # x (B, C, HW)
            pl.BlockSpec(memory_space=pltpu.MemorySpace.VMEM),   # padded fc row
            pl.BlockSpec(memory_space=pltpu.MemorySpace.SMEM),   # conv w + scalars
        ],
        out_specs=pl.BlockSpec(memory_space=pltpu.MemorySpace.VMEM),
    )(x_flat, fc_row, params)


def _reference_forward(x, conv_w, conv_b, bn_gamma, bn_beta, fc_w, fc_b,
                       eps=2e-5):
    """Pure-JAX reference (same math, outside Pallas) for a sanity check."""
    conv = jax.lax.conv_general_dilated(
        x.astype(jnp.float32), conv_w.astype(jnp.float32),
        window_strides=(1, 1), padding="VALID",
        dimension_numbers=("NCHW", "OIHW", "NCHW")) + conv_b     # (B,1,Ho,Wo)
    mean = jnp.mean(conv)
    var = jnp.mean((conv - mean) ** 2)
    y = bn_gamma * (conv - mean) / jnp.sqrt(var + eps) + bn_beta
    r = jnp.maximum(y, 0.0).reshape(x.shape[0], -1)
    logits = r @ fc_w.astype(jnp.float32)[:, None] + fc_b        # (B,1)
    return jnp.where(logits > 20.0, logits, jnp.log1p(jnp.exp(logits)))


if __name__ == "__main__":
    key = jax.random.PRNGKey(0)
    B, C, H = 2, 4, 16          # in_features=4, map_size=16 -> fc in = 14*14
    Ho = Wo = H - 2
    P = Ho * Wo

    k = jax.random.split(key, 5)
    x = jax.random.normal(k[0], (B, C, H, H), jnp.float32)

    # Deterministic parameter init (PyTorch-like uniform fan-in bounds).
    bc = 1.0 / jnp.sqrt(C * KH * KW)
    conv_w = jax.random.uniform(k[1], (1, C, KH, KW), jnp.float32, -bc, bc)
    conv_b = jax.random.uniform(k[2], (), jnp.float32, -bc, bc)
    bn_gamma = jnp.float32(1.0)     # BatchNorm2d default affine init
    bn_beta = jnp.float32(0.0)
    bf = 1.0 / jnp.sqrt(P)
    fc_w = jax.random.uniform(k[3], (P,), jnp.float32, -bf, bf)
    fc_b = jax.random.uniform(k[4], (), jnp.float32, -bf, bf)

    # Parameter-side constants: built once, outside the per-call hot path.
    fc_row, params = prepare_scale_module_params(
        conv_w, conv_b, bn_gamma, bn_beta, fc_w, fc_b, height=H, width=H)

    fwd = jax.jit(scale_module_forward)
    out = jax.block_until_ready(fwd(x, fc_row, params))
    assert out.shape == (B, 1) and out.dtype == jnp.float32

    ref = _reference_forward(x, conv_w, conv_b, bn_gamma, bn_beta, fc_w, fc_b)
    assert jnp.allclose(out, ref, rtol=2e-3, atol=2e-3), (out, ref)

    print("KERNEL_OK")
</pallas_src>

<mosaic_0001>
module attributes {stable_mosaic.version = 11 : i64} {
  func.func @_scale_module_kernel(%arg0: memref<2x4x256xf32, #tpu.memory_space<vmem>>, %arg1: memref<1x256xf32, #tpu.memory_space<vmem>>, %arg2: memref<40xf32, #tpu.memory_space<smem>>, %arg3: memref<2x1xf32, #tpu.memory_space<vmem>>) attributes {dimension_semantics = [], scalar_prefetch = 0 : i64, scratch_operands = 0 : i64, tpu.core_type = #tpu.core_type<tc>} {
    %c0 = arith.constant 0 : index
    %c0_0 = arith.constant 0 : index
    %c0_1 = arith.constant 0 : index
    %0 = vector.load %arg0[%c0, %c0_0, %c0_1] : memref<2x4x256xf32, #tpu.memory_space<vmem>>, vector<2x4x256xf32>
    %1 = vector.extract_strided_slice %0 {offsets = [0, 0, 0], sizes = [2, 1, 256], strides = [1, 1, 1]} : vector<2x4x256xf32> to vector<2x1x256xf32>
    %2 = vector.shape_cast %1 : vector<2x1x256xf32> to vector<2x256xf32>
    %3 = vector.extract_strided_slice %0 {offsets = [0, 1, 0], sizes = [2, 1, 256], strides = [1, 1, 1]} : vector<2x4x256xf32> to vector<2x1x256xf32>
    %4 = vector.shape_cast %3 : vector<2x1x256xf32> to vector<2x256xf32>
    %5 = vector.extract_strided_slice %0 {offsets = [0, 2, 0], sizes = [2, 1, 256], strides = [1, 1, 1]} : vector<2x4x256xf32> to vector<2x1x256xf32>
    %6 = vector.shape_cast %5 : vector<2x1x256xf32> to vector<2x256xf32>
    %7 = vector.extract_strided_slice %0 {offsets = [0, 3, 0], sizes = [2, 1, 256], strides = [1, 1, 1]} : vector<2x4x256xf32> to vector<2x1x256xf32>
    %8 = vector.shape_cast %7 : vector<2x1x256xf32> to vector<2x256xf32>
    %c0_2 = arith.constant 0 : index
    %9 = memref.load %arg2[%c0_2] : memref<40xf32, #tpu.memory_space<smem>>
    %c1 = arith.constant 1 : index
    %10 = memref.load %arg2[%c1] : memref<40xf32, #tpu.memory_space<smem>>
    %c2 = arith.constant 2 : index
    %11 = memref.load %arg2[%c2] : memref<40xf32, #tpu.memory_space<smem>>
    %c3 = arith.constant 3 : index
    %12 = memref.load %arg2[%c3] : memref<40xf32, #tpu.memory_space<smem>>
    %c4 = arith.constant 4 : index
    %13 = memref.load %arg2[%c4] : memref<40xf32, #tpu.memory_space<smem>>
    %c5 = arith.constant 5 : index
    %14 = memref.load %arg2[%c5] : memref<40xf32, #tpu.memory_space<smem>>
    %c6 = arith.constant 6 : index
    %15 = memref.load %arg2[%c6] : memref<40xf32, #tpu.memory_space<smem>>
    %c7 = arith.constant 7 : index
    %16 = memref.load %arg2[%c7] : memref<40xf32, #tpu.memory_space<smem>>
    %c8 = arith.constant 8 : index
    %17 = memref.load %arg2[%c8] : memref<40xf32, #tpu.memory_space<smem>>
    %c9 = arith.constant 9 : index
    %18 = memref.load %arg2[%c9] : memref<40xf32, #tpu.memory_space<smem>>
    %c10 = arith.constant 10 : index
    %19 = memref.load %arg2[%c10] : memref<40xf32, #tpu.memory_space<smem>>
    %c11 = arith.constant 11 : index
    %20 = memref.load %arg2[%c11] : memref<40xf32, #tpu.memory_space<smem>>
    %c12 = arith.constant 12 : index
    %21 = memref.load %arg2[%c12] : memref<40xf32, #tpu.memory_space<smem>>
    %c13 = arith.constant 13 : index
    %22 = memref.load %arg2[%c13] : memref<40xf32, #tpu.memory_space<smem>>
    %c14 = arith.constant 14 : index
    %23 = memref.load %arg2[%c14] : memref<40xf32, #tpu.memory_space<smem>>
    %c15 = arith.constant 15 : index
    %24 = memref.load %arg2[%c15] : memref<40xf32, #tpu.memory_space<smem>>
    %c16 = arith.constant 16 : index
    %25 = memref.load %arg2[%c16] : memref<40xf32, #tpu.memory_space<smem>>
    %c17 = arith.constant 17 : index
    %26 = memref.load %arg2[%c17] : memref<40xf32, #tpu.memory_space<smem>>
    %c18 = arith.constant 18 : index
    %27 = memref.load %arg2[%c18] : memref<40xf32, #tpu.memory_space<smem>>
    %c19 = arith.constant 19 : index
    %28 = memref.load %arg2[%c19] : memref<40xf32, #tpu.memory_space<smem>>
    %c20 = arith.constant 20 : index
    %29 = memref.load %arg2[%c20] : memref<40xf32, #tpu.memory_space<smem>>
    %c21 = arith.constant 21 : index
    %30 = memref.load %arg2[%c21] : memref<40xf32, #tpu.memory_space<smem>>
    %c22 = arith.constant 22 : index
    %31 = memref.load %arg2[%c22] : memref<40xf32, #tpu.memory_space<smem>>
    %c23 = arith.constant 23 : index
    %32 = memref.load %arg2[%c23] : memref<40xf32, #tpu.memory_space<smem>>
    %c24 = arith.constant 24 : index
    %33 = memref.load %arg2[%c24] : memref<40xf32, #tpu.memory_space<smem>>
    %c25 = arith.constant 25 : index
    %34 = memref.load %arg2[%c25] : memref<40xf32, #tpu.memory_space<smem>>
    %c26 = arith.constant 26 : index
    %35 = memref.load %arg2[%c26] : memref<40xf32, #tpu.memory_space<smem>>
    %c27 = arith.constant 27 : index
    %36 = memref.load %arg2[%c27] : memref<40xf32, #tpu.memory_space<smem>>
    %c28 = arith.constant 28 : index
    %37 = memref.load %arg2[%c28] : memref<40xf32, #tpu.memory_space<smem>>
    %c29 = arith.constant 29 : index
    %38 = memref.load %arg2[%c29] : memref<40xf32, #tpu.memory_space<smem>>
    %c30 = arith.constant 30 : index
    %39 = memref.load %arg2[%c30] : memref<40xf32, #tpu.memory_space<smem>>
    %c31 = arith.constant 31 : index
    %40 = memref.load %arg2[%c31] : memref<40xf32, #tpu.memory_space<smem>>
    %c32 = arith.constant 32 : index
    %41 = memref.load %arg2[%c32] : memref<40xf32, #tpu.memory_space<smem>>
    %c33 = arith.constant 33 : index
    %42 = memref.load %arg2[%c33] : memref<40xf32, #tpu.memory_space<smem>>
    %c34 = arith.constant 34 : index
    %43 = memref.load %arg2[%c34] : memref<40xf32, #tpu.memory_space<smem>>
    %c35 = arith.constant 35 : index
    %44 = memref.load %arg2[%c35] : memref<40xf32, #tpu.memory_space<smem>>
    %c37 = arith.constant 37 : index
    %45 = memref.load %arg2[%c37] : memref<40xf32, #tpu.memory_space<smem>>
    %c38 = arith.constant 38 : index
    %46 = memref.load %arg2[%c38] : memref<40xf32, #tpu.memory_space<smem>>
    %c39 = arith.constant 39 : index
    %47 = memref.load %arg2[%c39] : memref<40xf32, #tpu.memory_space<smem>>
    %48 = vector.broadcast %9 : f32 to vector<2x256xf32>
    %49 = arith.mulf %2, %48 : vector<2x256xf32>
    %50 = vector.broadcast %18 : f32 to vector<2x256xf32>
    %51 = arith.mulf %4, %50 : vector<2x256xf32>
    %52 = arith.addf %49, %51 : vector<2x256xf32>
    %53 = vector.broadcast %27 : f32 to vector<2x256xf32>
    %54 = arith.mulf %6, %53 : vector<2x256xf32>
    %55 = arith.addf %52, %54 : vector<2x256xf32>
    %56 = vector.broadcast %36 : f32 to vector<2x256xf32>
    %57 = arith.mulf %8, %56 : vector<2x256xf32>
    %58 = arith.addf %55, %57 : vector<2x256xf32>
    %59 = vector.broadcast %10 : f32 to vector<2x256xf32>
    %60 = arith.mulf %2, %59 : vector<2x256xf32>
    %61 = vector.broadcast %19 : f32 to vector<2x256xf32>
    %62 = arith.mulf %4, %61 : vector<2x256xf32>
    %63 = arith.addf %60, %62 : vector<2x256xf32>
    %64 = vector.broadcast %28 : f32 to vector<2x256xf32>
    %65 = arith.mulf %6, %64 : vector<2x256xf32>
    %66 = arith.addf %63, %65 : vector<2x256xf32>
    %67 = vector.broadcast %37 : f32 to vector<2x256xf32>
    %68 = arith.mulf %8, %67 : vector<2x256xf32>
    %69 = arith.addf %66, %68 : vector<2x256xf32>
    %c255_i32 = arith.constant 255 : i32
    %70 = tpu.dynamic_rotate %69 by %c255_i32 dim 1 : vector<2x256xf32>, i32 -> vector<2x256xf32>
    %71 = arith.addf %58, %70 : vector<2x256xf32>
    %72 = vector.broadcast %11 : f32 to vector<2x256xf32>
    %73 = arith.mulf %2, %72 : vector<2x256xf32>
    %74 = vector.broadcast %20 : f32 to vector<2x256xf32>
    %75 = arith.mulf %4, %74 : vector<2x256xf32>
    %76 = arith.addf %73, %75 : vector<2x256xf32>
    %77 = vector.broadcast %29 : f32 to vector<2x256xf32>
    %78 = arith.mulf %6, %77 : vector<2x256xf32>
    %79 = arith.addf %76, %78 : vector<2x256xf32>
    %80 = vector.broadcast %38 : f32 to vector<2x256xf32>
    %81 = arith.mulf %8, %80 : vector<2x256xf32>
    %82 = arith.addf %79, %81 : vector<2x256xf32>
    %c254_i32 = arith.constant 254 : i32
    %83 = tpu.dynamic_rotate %82 by %c254_i32 dim 1 : vector<2x256xf32>, i32 -> vector<2x256xf32>
    %84 = arith.addf %71, %83 : vector<2x256xf32>
    %85 = vector.broadcast %12 : f32 to vector<2x256xf32>
    %86 = arith.mulf %2, %85 : vector<2x256xf32>
    %87 = vector.broadcast %21 : f32 to vector<2x256xf32>
    %88 = arith.mulf %4, %87 : vector<2x256xf32>
    %89 = arith.addf %86, %88 : vector<2x256xf32>
    %90 = vector.broadcast %30 : f32 to vector<2x256xf32>
    %91 = arith.mulf %6, %90 : vector<2x256xf32>
    %92 = arith.addf %89, %91 : vector<2x256xf32>
    %93 = vector.broadcast %39 : f32 to vector<2x256xf32>
    %94 = arith.mulf %8, %93 : vector<2x256xf32>
    %95 = arith.addf %92, %94 : vector<2x256xf32>
    %c240_i32 = arith.constant 240 : i32
    %96 = tpu.dynamic_rotate %95 by %c240_i32 dim 1 : vector<2x256xf32>, i32 -> vector<2x256xf32>
    %97 = arith.addf %84, %96 : vector<2x256xf32>
    %98 = vector.broadcast %13 : f32 to vector<2x256xf32>
    %99 = arith.mulf %2, %98 : vector<2x256xf32>
    %100 = vector.broadcast %22 : f32 to vector<2x256xf32>
    %101 = arith.mulf %4, %100 : vector<2x256xf32>
    %102 = arith.addf %99, %101 : vector<2x256xf32>
    %103 = vector.broadcast %31 : f32 to vector<2x256xf32>
    %104 = arith.mulf %6, %103 : vector<2x256xf32>
    %105 = arith.addf %102, %104 : vector<2x256xf32>
    %106 = vector.broadcast %40 : f32 to vector<2x256xf32>
    %107 = arith.mulf %8, %106 : vector<2x256xf32>
    %108 = arith.addf %105, %107 : vector<2x256xf32>
    %c239_i32 = arith.constant 239 : i32
    %109 = tpu.dynamic_rotate %108 by %c239_i32 dim 1 : vector<2x256xf32>, i32 -> vector<2x256xf32>
    %110 = arith.addf %97, %109 : vector<2x256xf32>
    %111 = vector.broadcast %14 : f32 to vector<2x256xf32>
    %112 = arith.mulf %2, %111 : vector<2x256xf32>
    %113 = vector.broadcast %23 : f32 to vector<2x256xf32>
    %114 = arith.mulf %4, %113 : vector<2x256xf32>
    %115 = arith.addf %112, %114 : vector<2x256xf32>
    %116 = vector.broadcast %32 : f32 to vector<2x256xf32>
    %117 = arith.mulf %6, %116 : vector<2x256xf32>
    %118 = arith.addf %115, %117 : vector<2x256xf32>
    %119 = vector.broadcast %41 : f32 to vector<2x256xf32>
    %120 = arith.mulf %8, %119 : vector<2x256xf32>
    %121 = arith.addf %118, %120 : vector<2x256xf32>
    %c238_i32 = arith.constant 238 : i32
    %122 = tpu.dynamic_rotate %121 by %c238_i32 dim 1 : vector<2x256xf32>, i32 -> vector<2x256xf32>
    %123 = arith.addf %110, %122 : vector<2x256xf32>
    %124 = vector.broadcast %15 : f32 to vector<2x256xf32>
    %125 = arith.mulf %2, %124 : vector<2x256xf32>
    %126 = vector.broadcast %24 : f32 to vector<2x256xf32>
    %127 = arith.mulf %4, %126 : vector<2x256xf32>
    %128 = arith.addf %125, %127 : vector<2x256xf32>
    %129 = vector.broadcast %33 : f32 to vector<2x256xf32>
    %130 = arith.mulf %6, %129 : vector<2x256xf32>
    %131 = arith.addf %128, %130 : vector<2x256xf32>
    %132 = vector.broadcast %42 : f32 to vector<2x256xf32>
    %133 = arith.mulf %8, %132 : vector<2x256xf32>
    %134 = arith.addf %131, %133 : vector<2x256xf32>
    %c224_i32 = arith.constant 224 : i32
    %135 = tpu.dynamic_rotate %134 by %c224_i32 dim 1 : vector<2x256xf32>, i32 -> vector<2x256xf32>
    %136 = arith.addf %123, %135 : vector<2x256xf32>
    %137 = vector.broadcast %16 : f32 to vector<2x256xf32>
    %138 = arith.mulf %2, %137 : vector<2x256xf32>
    %139 = vector.broadcast %25 : f32 to vector<2x256xf32>
    %140 = arith.mulf %4, %139 : vector<2x256xf32>
    %141 = arith.addf %138, %140 : vector<2x256xf32>
    %142 = vector.broadcast %34 : f32 to vector<2x256xf32>
    %143 = arith.mulf %6, %142 : vector<2x256xf32>
    %144 = arith.addf %141, %143 : vector<2x256xf32>
    %145 = vector.broadcast %43 : f32 to vector<2x256xf32>
    %146 = arith.mulf %8, %145 : vector<2x256xf32>
    %147 = arith.addf %144, %146 : vector<2x256xf32>
    %c223_i32 = arith.constant 223 : i32
    %148 = tpu.dynamic_rotate %147 by %c223_i32 dim 1 : vector<2x256xf32>, i32 -> vector<2x256xf32>
    %149 = arith.addf %136, %148 : vector<2x256xf32>
    %150 = vector.broadcast %17 : f32 to vector<2x256xf32>
    %151 = arith.mulf %2, %150 : vector<2x256xf32>
    %152 = vector.broadcast %26 : f32 to vector<2x256xf32>
    %153 = arith.mulf %4, %152 : vector<2x256xf32>
    %154 = arith.addf %151, %153 : vector<2x256xf32>
    %155 = vector.broadcast %35 : f32 to vector<2x256xf32>
    %156 = arith.mulf %6, %155 : vector<2x256xf32>
    %157 = arith.addf %154, %156 : vector<2x256xf32>
    %158 = vector.broadcast %44 : f32 to vector<2x256xf32>
    %159 = arith.mulf %8, %158 : vector<2x256xf32>
    %160 = arith.addf %157, %159 : vector<2x256xf32>
    %c222_i32 = arith.constant 222 : i32
    %161 = tpu.dynamic_rotate %160 by %c222_i32 dim 1 : vector<2x256xf32>, i32 -> vector<2x256xf32>
    %162 = arith.addf %149, %161 : vector<2x256xf32>
    %163 = tpu.iota {dimensions = array<i32: 1>} : vector<1x256xi32>
    %164 = arith.sitofp %163 : vector<1x256xi32> to vector<1x256xf32>
    %cst = arith.constant 5.000000e-01 : f32
    %165 = vector.broadcast %cst : f32 to vector<1x256xf32>
    %166 = arith.addf %164, %165 : vector<1x256xf32>
    %cst_3 = arith.constant 6.250000e-02 : f32
    %167 = vector.broadcast %cst_3 : f32 to vector<1x256xf32>
    %168 = arith.mulf %166, %167 : vector<1x256xf32>
    %169 = math.floor %168 : vector<1x256xf32>
    %cst_4 = arith.constant 1.600000e+01 : f32
    %170 = vector.broadcast %cst_4 : f32 to vector<1x256xf32>
    %171 = arith.mulf %169, %170 : vector<1x256xf32>
    %172 = arith.subf %164, %171 : vector<1x256xf32>
    %cst_5 = arith.constant 1.400000e+01 : f32
    %173 = vector.broadcast %cst_5 : f32 to vector<1x256xf32>
    %174 = arith.cmpf olt, %172, %173 : vector<1x256xf32>
    %cst_6 = arith.constant 1.400000e+01 : f32
    %175 = vector.broadcast %cst_6 : f32 to vector<1x256xf32>
    %176 = arith.cmpf olt, %169, %175 : vector<1x256xf32>
    %177 = arith.andi %174, %176 : vector<1x256xi1>
    %cst_7 = arith.constant 0.000000e+00 : f32
    %178 = vector.shape_cast %177 : vector<1x256xi1> to vector<1x256xi1>
    %179 = vector.broadcast %178 : vector<1x256xi1> to vector<2x256xi1>
    %180 = vector.broadcast %cst_7 : f32 to vector<2x256xf32>
    %181 = arith.select %179, %162, %180 : vector<2x256xi1>, vector<2x256xf32>
    %182 = arith.mulf %181, %181 : vector<2x256xf32>
    %183 = tpu.concatenate %181, %182 in 0 : vector<2x256xf32>, vector<2x256xf32> -> vector<4x256xf32>
    %cst_8 = arith.constant dense<0.000000e+00> : vector<4xf32>
    %184 = vector.multi_reduction <add>, %183, %cst_8 [1] : vector<4x256xf32> to vector<4xf32>
    %185 = vector.shape_cast %184 : vector<4xf32> to vector<4x1xf32>
    %186 = vector.extract_strided_slice %185 {offsets = [0, 0], sizes = [2, 1], strides = [1, 1]} : vector<4x1xf32> to vector<2x1xf32>
    %187 = vector.shape_cast %186 : vector<2x1xf32> to vector<1x2x1xf32>
    %cst_9 = arith.constant dense<0.000000e+00> : vector<1xf32>
    %188 = vector.multi_reduction <add>, %187, %cst_9 [1, 2] : vector<1x2x1xf32> to vector<1xf32>
    %189 = vector.shape_cast %188 : vector<1xf32> to vector<1x1x1xf32>
    %190 = vector.extract %189[0, 0, 0] : f32 from vector<1x1x1xf32>
    %191 = vector.broadcast %190 : f32 to vector<1x1xf32>
    %cst_10 = arith.constant 0.00255102036 : f32
    %192 = vector.broadcast %cst_10 : f32 to vector<1x1xf32>
    %193 = arith.mulf %191, %192 : vector<1x1xf32>
    %194 = vector.extract_strided_slice %185 {offsets = [2, 0], sizes = [2, 1], strides = [1, 1]} : vector<4x1xf32> to vector<2x1xf32>
    %195 = vector.shape_cast %194 : vector<2x1xf32> to vector<1x2x1xf32>
    %cst_11 = arith.constant dense<0.000000e+00> : vector<1xf32>
    %196 = vector.multi_reduction <add>, %195, %cst_11 [1, 2] : vector<1x2x1xf32> to vector<1xf32>
    %197 = vector.shape_cast %196 : vector<1xf32> to vector<1x1x1xf32>
    %198 = vector.extract %197[0, 0, 0] : f32 from vector<1x1x1xf32>
    %199 = vector.broadcast %198 : f32 to vector<1x1xf32>
    %cst_12 = arith.constant 0.00255102036 : f32
    %200 = vector.broadcast %cst_12 : f32 to vector<1x1xf32>
    %201 = arith.mulf %199, %200 : vector<1x1xf32>
    %202 = arith.mulf %193, %193 : vector<1x1xf32>
    %203 = arith.subf %201, %202 : vector<1x1xf32>
    %cst_13 = arith.constant 0.000000e+00 : f32
    %204 = vector.broadcast %cst_13 : f32 to vector<1x1xf32>
    %205 = arith.maximumf %203, %204 : vector<1x1xf32>
    %cst_14 = arith.constant 2.000000e-05 : f32
    %206 = vector.broadcast %cst_14 : f32 to vector<1x1xf32>
    %207 = arith.addf %205, %206 : vector<1x1xf32>
    %208 = math.rsqrt %207 : vector<1x1xf32>
    %209 = vector.broadcast %45 : f32 to vector<1x1xf32>
    %210 = arith.mulf %209, %208 : vector<1x1xf32>
    %211 = arith.mulf %210, %193 : vector<1x1xf32>
    %212 = vector.broadcast %46 : f32 to vector<1x1xf32>
    %213 = arith.subf %212, %211 : vector<1x1xf32>
    %214 = vector.broadcast %210 : vector<1x1xf32> to vector<2x256xf32>
    %215 = arith.mulf %162, %214 : vector<2x256xf32>
    %216 = vector.broadcast %213 : vector<1x1xf32> to vector<2x256xf32>
    %217 = arith.addf %215, %216 : vector<2x256xf32>
    %cst_15 = arith.constant 0.000000e+00 : f32
    %218 = vector.broadcast %cst_15 : f32 to vector<2x256xf32>
    %219 = arith.maximumf %217, %218 : vector<2x256xf32>
    %c0_16 = arith.constant 0 : index
    %c0_17 = arith.constant 0 : index
    %220 = vector.load %arg1[%c0_16, %c0_17] : memref<1x256xf32, #tpu.memory_space<vmem>>, vector<1x256xf32>
    %221 = vector.broadcast %220 : vector<1x256xf32> to vector<2x256xf32>
    %222 = arith.mulf %219, %221 : vector<2x256xf32>
    %cst_18 = arith.constant dense<0.000000e+00> : vector<2xf32>
    %223 = vector.multi_reduction <add>, %222, %cst_18 [1] : vector<2x256xf32> to vector<2xf32>
    %224 = vector.shape_cast %223 : vector<2xf32> to vector<2x1xf32>
    %225 = vector.broadcast %47 : f32 to vector<2x1xf32>
    %226 = arith.addf %224, %225 : vector<2x1xf32>
    %cst_19 = arith.constant 2.000000e+01 : f32
    %227 = vector.broadcast %cst_19 : f32 to vector<2x1xf32>
    %228 = arith.cmpf ogt, %226, %227 : vector<2x1xf32>
    %cst_20 = arith.constant 2.000000e+01 : f32
    %229 = vector.broadcast %cst_20 : f32 to vector<2x1xf32>
    %230 = arith.minimumf %226, %229 : vector<2x1xf32>
    %231 = math.exp %230 : vector<2x1xf32>
    %cst_21 = arith.constant 1.000000e+00 : f32
    %232 = vector.broadcast %cst_21 : f32 to vector<2x1xf32>
    %233 = arith.addf %232, %231 : vector<2x1xf32>
    %234 = math.log %233 : vector<2x1xf32>
    %235 = arith.select %228, %226, %234 : vector<2x1xi1>, vector<2x1xf32>
    %c0_22 = arith.constant 0 : index
    %c0_23 = arith.constant 0 : index
    %236 = vector.load %arg3[%c0_22, %c0_23] : memref<2x1xf32, #tpu.memory_space<vmem>>, vector<2x1xf32>
    tpu.vector_store %arg3[%c0_22, %c0_23], %235 {strides = array<i32>} : memref<2x1xf32, #tpu.memory_space<vmem>>, vector<2x1xf32>,
    return
  }
}

</mosaic_0001>

<bundles_post_ra>
// kernel: scale_module_forward.1
= control target key start
LH: loop header
LB: loop body
LE: loop exit
PB: predicated region body
PF: predicated region fallthrough
CT: control target
= control target key end

     0   :  { %8 = vsyncpa [#allocation3], 0  ;;  %s1342_s0 = inlined_call_operand.vmem [shape: f32[2,4,256], index: 0, kind: input, shape index: {}]   ;;  %s1343_s1 = inlined_call_operand.vmem [shape: f32[1,256], index: 1, kind: input, shape index: {}]   ;;  %s1344_s2 = inlined_call_operand.vmem [shape: f32[40], index: 2, kind: input, shape index: {}]   ;;  %s1345_s3 = inlined_call_operand.vmem [shape: f32[2,1], index: 3, kind: output, shape index: {}]  }
   0x1   :  { %s19_s14 = sshll.u32 %s1344_s2, 4  ;;  %s20_s14 = int_to_ptr.vmem [resolvable:$true] %s19_s14 }
   0x2   :  { %s1023_s15 = scalar_lea.vmem %s20_s14, 16  ;;  %p1028_p1 = scmp.lt.s32.totalorder %s20_s14, %s20_s14 }
   0x3   :  { %p1024_p0 = scmp.ne.s32.totalorder %s20_s14, %s1023_s15  ;;  %p1029_p2 = scmp.lt.s32.totalorder %s1023_s15, %s1023_s15 }
   0x5   :  { %p1030_p3 = por %p1029_p2, %p1028_p1 }
   0x7   :  { %p1031_p4 = pnand %p1030_p3, %p1024_p0 }
   0x9   :  { %1034 = shalt.err (!%p1031_p4)
}
   0xa   :  { %s1037_s16 = smov [#allocation2]  }
   0xb   :  { %22 = dma.vmem_to_smem %s20_s14, 16, %s1037_s16, [#allocation3]  }
   0xc   :  { %1035 = dma.done.wait [#allocation3], 16  }
   0xd   :  { %1036 = vsyncadd [#allocation3], 4294967280 }
   0xe   :  { %26 = sfence }
   0xf   :  { %s913_s17 = sld [smem:[#allocation2 + $0x2]]  ;;  %v154_v0 = vlaneseq  ;;  %v1077_v2 = vld [vmem:[%s1342_s0] sm:$0xff]  ;;  %v1082_v3 = vld [vmem:[%s1342_s0 + $0x8] sm:$0xff]  ;;  %vm170_vm0 = vcmask 1041409   ;;  %s1038_s7 = smov 126   ;;  %vm800_vm15 = vcmask 1041408  }
  0x10   :  { %s922_s18 = sld [smem:[#allocation2 + $0xb]]  ;;  %s1039_s9 = smov 127  }
  0x11   :  { %s931_s19 = sld [smem:[#allocation2 + $0x14]]  ;;  %v1070_v1 = vshrl.u32 %v154_v0, 7 }
  0x12   :  { %s940_s20 = sld [smem:[#allocation2 + $0x1d]] }
  0x13   :  { %s1072_s2 = sld [smem:[#allocation2 + $0x1]]  ;;  %v1089_v5 = vsub.s32 0, %v1070_v1  ;;  %v1100_v15 = vsub.s32 4, %v1070_v1 }
  0x14   :  { %s1084_s25 = sld [smem:[#allocation2 + $0xa]] }
  0x15   :  { %v192_v4 = vstv %s913_s17  ;;  %s1086_s26 = sld [smem:[#allocation2 + $0x13]]  ;;  %s1040_s17 = smov 112  }
  0x16   :  { %v193_v6 = vmul.f32 %v192_v4, %v1077_v2  ;;  %v195_v7 = vstv %s922_s18  ;;  %s1092_s27 = sld [smem:[#allocation2 + $0x1c]]  ;;  %v194_v8 = vmul.f32 %v192_v4, %v1082_v3 }
  0x17   :  { %v196_v9 = vmul.f32 %v195_v7, %v1077_v2  ;;  %v197_v10 = vmul.f32 %v195_v7, %v1082_v3  ;;  %v208_v11 = vstv %s931_s19  ;;  %s1104_s0 = sld [smem:[#allocation2 + $0x3]] }
  0x18   :  { %v209_v12 = vmul.f32 %v208_v11, %v1077_v2  ;;  %v210_v13 = vmul.f32 %v208_v11, %v1082_v3  ;;  %v221_v14 = vstv %s940_s20  ;;  %s1108_s28 = sld [smem:[#allocation2 + $0xc]]  ;;  %s1041_s20 = smov 111  }
  0x19   :  { %v962_v16 = vrot.slane %v196_v9, 9  ;;  %v963_v17 = vrot.slane %v197_v10, 9  ;;  %v222_v18 = vmul.f32 %v221_v14, %v1077_v2  ;;  %v223_v19 = vmul.f32 %v221_v14, %v1082_v3  ;;  %s1110_s29 = sld [smem:[#allocation2 + $0x15]] }
  0x1a   :  { %v964_v20 = vrot.slane %v209_v12, 10  ;;  %v965_v21 = vrot.slane %v210_v13, 10  ;;  %v110_v22 = vstv %s1072_s2  ;;  %v113_v23 = vstv %s1084_s25  ;;  %s1122_s30 = sld [smem:[#allocation2 + $0x1e]]  ;;  %s1042_s25 = smov 110  }
  0x1b   :  { %v206_v24 = vadd.f32 %v962_v16, %v193_v6  ;;  %v207_v25 = vadd.f32 %v963_v17, %v194_v8  ;;  %v966_v26 = vrot.slane %v222_v18, 11  ;;  %v967_v27 = vrot.slane %v223_v19, 11  ;;  %s1124_s4 = sld [smem:[#allocation2 + $0x4]] }
  0x1c   :  { %v111_v28 = vmul.f32 %v110_v22, %v1077_v2  ;;  %v112_v29 = vmul.f32 %v110_v22, %v1082_v3  ;;  %v114_v30 = vmul.f32 %v113_v23, %v1077_v2  ;;  %v115_v31 = vmul.f32 %v113_v23, %v1082_v3  ;;  %s1130_s5 = sld [smem:[#allocation2 + $0xd]] }
  0x1d   :  { %v219_v32 = vadd.f32 %v964_v20, %v206_v24  ;;  %v220_v33 = vadd.f32 %v965_v21, %v207_v25  ;;  %v126_v34 = vstv %s1086_s26  ;;  %v139_v35 = vstv %s1092_s27  ;;  %s1136_s6 = sld [smem:[#allocation2 + $0x16]] }
  0x1e   :  { %v956_v36 = vrot.slane %v114_v30, 9  ;;  %v957_v37 = vrot.slane %v115_v31, 9  ;;  %v127_v38 = vmul.f32 %v126_v34, %v1077_v2  ;;  %v128_v39 = vmul.f32 %v126_v34, %v1082_v3  ;;  %s1140_s8 = sld [smem:[#allocation2 + $0x1f]] }
  0x1f   :  { %v232_v40 = vadd.f32 %v966_v26, %v219_v32  ;;  %v233_v41 = vadd.f32 %v967_v27, %v220_v33  ;;  %v140_v42 = vmul.f32 %v139_v35, %v1077_v2  ;;  %v141_v43 = vmul.f32 %v139_v35, %v1082_v3  ;;  %s1156_s10 = sld [smem:[#allocation2 + $0x5]] }
  0x20   :  { %v124_v44 = vadd.f32 %v956_v36, %v111_v28  ;;  %v125_v45 = vadd.f32 %v957_v37, %v112_v29  ;;  %v958_v46 = vrot.slane %v127_v38, 10  ;;  %v959_v47 = vrot.slane %v128_v39, 10  ;;  %s1162_s11 = sld [smem:[#allocation2 + $0xe]] }
  0x21   :  { %v239_v48 = vrot.slane %v232_v40, %v1089_v5  ;;  %v247_v49 = vrot.slane %v233_v41, %v1089_v5  ;;  %v960_v50 = vrot.slane %v140_v42, 11  ;;  %v961_v51 = vrot.slane %v141_v43, 11  ;;  %s1165_s12 = sld [smem:[#allocation2 + $0x17]] }
  0x22   :  { %v137_v52 = vadd.f32 %v958_v46, %v124_v44  ;;  %v138_v53 = vadd.f32 %v959_v47, %v125_v45  ;;  %v243_v54 = vrot.slane %v232_v40, %v1100_v15  ;;  %v251_v55 = vrot.slane %v233_v41, %v1100_v15  ;;  %s1172_s13 = sld [smem:[#allocation2 + $0x20]] }
  0x23   :  { %v252_v56 = vsel %vm170_vm0, %v247_v49, %v239_v48  ;;  %v271_v57 = vstv %s1104_s0  ;;  %v274_v58 = vstv %s1108_s28  ;;  %v287_v59 = vstv %s1110_s29  ;;  %s1180_s14 = sld [smem:[#allocation2 + $0x6]]  ;;  %s1043_s0 = smov 96  }
  0x24   :  { %256 = vrot.lane.b32.xlu1 %v252_v56, %s1038_s7  ;;  %v150_v60 = vadd.f32 %v960_v50, %v137_v52  ;;  %v151_v61 = vadd.f32 %v961_v51, %v138_v53  ;;  %v253_v62 = vsel %vm170_vm0, %v251_v55, %v243_v54  ;;  %v272_v63 = vmul.f32 %v271_v57, %v1077_v2  ;;  %s1183_s15 = sld [smem:[#allocation2 + $0xf]]  ;;  %s1044_s28 = smov 95  }
  0x25   :  { %v273_v4 = vmul.f32 %v271_v57, %v1082_v3  ;;  %v275_v6 = vmul.f32 %v274_v58, %v1077_v2  ;;  %v276_v7 = vmul.f32 %v274_v58, %v1082_v3  ;;  %v288_v8 = vmul.f32 %v287_v59, %v1077_v2  ;;  %s1188_s16 = sld [smem:[#allocation2 + $0x18]]  ;;  %s1045_s29 = smov 94  }
  0x26   :  { %v157_v9 = vrot.slane %v150_v60, %v1089_v5  ;;  %v165_v10 = vrot.slane %v151_v61, %v1089_v5  ;;  %v161_v11 = vrot.slane %v150_v60, %v1100_v15  ;;  %v169_v12 = vrot.slane %v151_v61, %v1100_v15  ;;  %s1193_s18 = sld [smem:[#allocation2 + $0x21]] }
  0x27   :  { %v968_v13 = vrot.slane %v275_v6, 9  ;;  %v969_v14 = vrot.slane %v276_v7, 9  ;;  %v289_v16 = vmul.f32 %v287_v59, %v1082_v3  ;;  %v970_v17 = vrot.slane %v288_v8, 10  ;;  %s1208_s19 = sld [smem:[#allocation2 + $0x7]] }
  0x28   :  { %v171_v18 = vsel %vm170_vm0, %v165_v10, %v157_v9  ;;  %258 = vrot.lane.b32.xlu1 %v253_v62, %s1038_s7  ;;  %v172_v19 = vsel %vm170_vm0, %v169_v12, %v161_v11  ;;  %v300_v20 = vstv %s1122_s30  ;;  %v350_v21 = vstv %s1124_s4  ;;  %s1212_s2 = sld [smem:[#allocation2 + $0x10]] }
  0x29   :  { %175 = vrot.lane.b32.xlu0 %v171_v18, %s1039_s9  ;;  %v285_v22 = vadd.f32 %v968_v13, %v272_v63  ;;  %v286_v23 = vadd.f32 %v969_v14, %v273_v4  ;;  %v971_v24 = vrot.slane %v289_v16, 10  ;;  %v301_v25 = vmul.f32 %v300_v20, %v1077_v2  ;;  %s1216_s21 = sld [smem:[#allocation2 + $0x19]] }
  0x2a   :  { %v302_v26 = vmul.f32 %v300_v20, %v1082_v3  ;;  %v351_v27 = vmul.f32 %v350_v21, %v1077_v2  ;;  %v352_v28 = vmul.f32 %v350_v21, %v1082_v3  ;;  %v353_v29 = vstv %s1130_s5  ;;  %s1222_s22 = sld [smem:[#allocation2 + $0x22]] }
  0x2b   :  { %v298_v30 = vadd.f32 %v970_v17, %v285_v22  ;;  %v299_v31 = vadd.f32 %v971_v24, %v286_v23  ;;  %v972_v32 = vrot.slane %v301_v25, 11  ;;  %v354_v33 = vmul.f32 %v353_v29, %v1077_v2  ;;  %s1232_s23 = sld [smem:[#allocation2 + $0x8]] }
  0x2c   :  { %v973_v34 = vrot.slane %v302_v26, 11  ;;  %v355_v35 = vmul.f32 %v353_v29, %v1082_v3  ;;  %v366_v36 = vstv %s1136_s6  ;;  %v379_v37 = vstv %s1140_s8  ;;  %s1236_s24 = sld [smem:[#allocation2 + $0x11]] }
  0x2d   :  { %177 = vrot.lane.b32.xlu0 %v172_v19, %s1039_s9  ;;  %v311_v38 = vadd.f32 %v972_v32, %v298_v30  ;;  %v974_v39 = vrot.slane %v354_v33, 9  ;;  %v367_v40 = vmul.f32 %v366_v36, %v1077_v2  ;;  %v368_v41 = vmul.f32 %v366_v36, %v1082_v3  ;;  %s1240_s26 = sld [smem:[#allocation2 + $0x1a]] }
  0x2e   :  { %v312_v42 = vadd.f32 %v973_v34, %v299_v31  ;;  %v975_v43 = vrot.slane %v355_v35, 9  ;;  %v380_v44 = vmul.f32 %v379_v37, %v1077_v2  ;;  %v381_v45 = vmul.f32 %v379_v37, %v1082_v3  ;;  %s1246_s27 = sld [smem:[#allocation2 + $0x23]] }
  0x2f   :  { %v322_v46 = vrot.slane %v311_v38, %v1100_v15  ;;  %v318_v47 = vrot.slane %v311_v38, %v1089_v5  ;;  %v364_v48 = vadd.f32 %v974_v39, %v351_v27  ;;  %v976_v49 = vrot.slane %v367_v40, 10  ;;  %s920_s30 = sld [smem:[#allocation2 + $0x9]] }
  0x30   :  { %v330_v50 = vrot.slane %v312_v42, %v1100_v15  ;;  %v326_v51 = vrot.slane %v312_v42, %v1089_v5  ;;  %v365_v52 = vadd.f32 %v975_v43, %v352_v28  ;;  %v977_v53 = vrot.slane %v368_v41, 10  ;;  %s29_s4 = sld [smem:[#allocation2]] }
  0x31   :  { %v377_v54 = vadd.f32 %v976_v49, %v364_v48  ;;  %v978_v55 = vrot.slane %v380_v44, 11  ;;  %v979_v56 = vrot.slane %v381_v45, 11  ;;  %v429_v57 = vstv %s1156_s10  ;;  %s929_s5 = sld [smem:[#allocation2 + $0x12]] }
  0x32   :  { %v332_v58 = vsel %vm170_vm0, %v330_v50, %v322_v46  ;;  %v331_v59 = vsel %vm170_vm0, %v326_v51, %v318_v47  ;;  %v378_v60 = vadd.f32 %v977_v53, %v365_v52  ;;  %v430_v61 = vmul.f32 %v429_v57, %v1077_v2  ;;  %s938_s6 = sld [smem:[#allocation2 + $0x1b]] }
  0x33   :  { %337 = vrot.lane.b32.xlu1 %v332_v58, %s1040_s17  ;;  %335 = vrot.lane.b32.xlu0 %v331_v59, %s1040_s17  ;;  %v390_v62 = vadd.f32 %v978_v55, %v377_v54  ;;  %v431_v63 = vmul.f32 %v429_v57, %v1082_v3  ;;  %v432_v4 = vstv %s1162_s11  ;;  %v445_v6 = vstv %s1165_s12  ;;  %s947_s9 = sld [smem:[#allocation2 + $0x25]] }
  0x34   :  { %v391_v7 = vadd.f32 %v979_v56, %v378_v60  ;;  %v433_v8 = vmul.f32 %v432_v4, %v1077_v2  ;;  %v434_v9 = vmul.f32 %v432_v4, %v1082_v3  ;;  %v446_v10 = vmul.f32 %v445_v6, %v1077_v2  ;;  %s948_s10 = sld [smem:[#allocation2 + $0x26]] }
  0x35   :  { %v401_v11 = vrot.slane %v390_v62, %v1100_v15  ;;  %v397_v12 = vrot.slane %v390_v62, %v1089_v5  ;;  %v447_v13 = vmul.f32 %v445_v6, %v1082_v3  ;;  %v458_v14 = vstv %s1172_s13 }
  0x36   :  { %v409_v16 = vrot.slane %v391_v7, %v1100_v15  ;;  %v405_v17 = vrot.slane %v391_v7, %v1089_v5  ;;  %v980_v18 = vrot.slane %v433_v8, 9  ;;  %v981_v19 = vrot.slane %v434_v9, 9 }
  0x37   :  { %v982_v20 = vrot.slane %v446_v10, 10  ;;  %v983_v21 = vrot.slane %v447_v13, 10  ;;  %v459_v22 = vmul.f32 %v458_v14, %v1077_v2  ;;  %v460_v23 = vmul.f32 %v458_v14, %v1082_v3 }
  0x38   :  { %v411_v24 = vsel %vm170_vm0, %v409_v16, %v401_v11  ;;  %v410_v25 = vsel %vm170_vm0, %v405_v17, %v397_v12  ;;  %v443_v26 = vadd.f32 %v980_v18, %v430_v61  ;;  %v444_v27 = vadd.f32 %v981_v19, %v431_v63 }
  0x39   :  { %416 = vrot.lane.b32.xlu1 %v411_v24, %s1041_s20  ;;  %414 = vrot.lane.b32.xlu0 %v410_v25, %s1041_s20  ;;  %v984_v28 = vrot.slane %v459_v22, 11  ;;  %v985_v29 = vrot.slane %v460_v23, 11  ;;  %v508_v30 = vstv %s1180_s14  ;;  %v511_v31 = vstv %s1183_s15 }
  0x3a   :  { %v456_v32 = vadd.f32 %v982_v20, %v443_v26  ;;  %v457_v33 = vadd.f32 %v983_v21, %v444_v27  ;;  %v509_v34 = vmul.f32 %v508_v30, %v1077_v2  ;;  %v510_v35 = vmul.f32 %v508_v30, %v1082_v3 }
  0x3b   :  { %v512_v36 = vmul.f32 %v511_v31, %v1077_v2  ;;  %v513_v37 = vmul.f32 %v511_v31, %v1082_v3  ;;  %v524_v38 = vstv %s1188_s16  ;;  %v537_v39 = vstv %s1193_s18 }
  0x3c   :  { %v469_v40 = vadd.f32 %v984_v28, %v456_v32  ;;  %v470_v41 = vadd.f32 %v985_v29, %v457_v33  ;;  %v525_v42 = vmul.f32 %v524_v38, %v1077_v2  ;;  %v526_v43 = vmul.f32 %v524_v38, %v1082_v3 }
  0x3d   :  { %v986_v44 = vrot.slane %v512_v36, 9  ;;  %v987_v45 = vrot.slane %v513_v37, 9  ;;  %v538_v46 = vmul.f32 %v537_v39, %v1077_v2  ;;  %v539_v47 = vmul.f32 %v537_v39, %v1082_v3 }
  0x3e   :  { %v480_v48 = vrot.slane %v469_v40, %v1100_v15  ;;  %v488_v49 = vrot.slane %v470_v41, %v1100_v15  ;;  %v476_v50 = vrot.slane %v469_v40, %v1089_v5  ;;  %v484_v51 = vrot.slane %v470_v41, %v1089_v5 }
  0x3f   :  { %v522_v52 = vadd.f32 %v986_v44, %v509_v34  ;;  %v523_v53 = vadd.f32 %v987_v45, %v510_v35  ;;  %v988_v54 = vrot.slane %v525_v42, 10  ;;  %v989_v55 = vrot.slane %v526_v43, 10 }
  0x40   :  { %v490_v56 = vsel %vm170_vm0, %v488_v49, %v480_v48  ;;  %v489_v57 = vsel %vm170_vm0, %v484_v51, %v476_v50  ;;  %v990_v58 = vrot.slane %v538_v46, 11  ;;  %v991_v59 = vrot.slane %v539_v47, 11 }
  0x41   :  { %495 = vrot.lane.b32.xlu1 %v490_v56, %s1042_s25  ;;  %493 = vrot.lane.b32.xlu0 %v489_v57, %s1042_s25  ;;  %v535_v60 = vadd.f32 %v988_v54, %v522_v52  ;;  %v536_v61 = vadd.f32 %v989_v55, %v523_v53  ;;  %v587_v62 = vstv %s1208_s19  ;;  %v590_v63 = vstv %s1212_s2 }
  0x42   :  { %v588_v4 = vmul.f32 %v587_v62, %v1077_v2  ;;  %v589_v6 = vmul.f32 %v587_v62, %v1082_v3  ;;  %v591_v7 = vmul.f32 %v590_v63, %v1077_v2  ;;  %v592_v8 = vmul.f32 %v590_v63, %v1082_v3 }
  0x43   :  { %v548_v9 = vadd.f32 %v990_v58, %v535_v60  ;;  %v549_v10 = vadd.f32 %v991_v59, %v536_v61  ;;  %v603_v11 = vstv %s1216_s21  ;;  %v616_v12 = vstv %s1222_s22 }
  0x44   :  { %v992_v13 = vrot.slane %v591_v7, 9  ;;  %v993_v14 = vrot.slane %v592_v8, 9  ;;  %v604_v16 = vmul.f32 %v603_v11, %v1077_v2  ;;  %v605_v17 = vmul.f32 %v603_v11, %v1082_v3 }
  0x45   :  { %v559_v18 = vrot.slane %v548_v9, %v1100_v15  ;;  %v567_v19 = vrot.slane %v549_v10, %v1100_v15  ;;  %v555_v20 = vrot.slane %v548_v9, %v1089_v5  ;;  %v563_v21 = vrot.slane %v549_v10, %v1089_v5 }
  0x46   :  { %v601_v22 = vadd.f32 %v992_v13, %v588_v4  ;;  %v602_v23 = vadd.f32 %v993_v14, %v589_v6  ;;  %v994_v24 = vrot.slane %v604_v16, 10  ;;  %v995_v25 = vrot.slane %v605_v17, 10 }
  0x47   :  { %v569_v26 = vsel %vm170_vm0, %v567_v19, %v559_v18  ;;  %v568_v27 = vsel %vm170_vm0, %v563_v21, %v555_v20  ;;  %v617_v28 = vmul.f32 %v616_v12, %v1077_v2  ;;  %v618_v29 = vmul.f32 %v616_v12, %v1082_v3 }
  0x48   :  { %574 = vrot.lane.b32.xlu1 %v569_v26, %s1043_s0  ;;  %572 = vrot.lane.b32.xlu0 %v568_v27, %s1043_s0  ;;  %v614_v30 = vadd.f32 %v994_v24, %v601_v22  ;;  %v615_v31 = vadd.f32 %v995_v25, %v602_v23  ;;  %v666_v32 = vstv %s1232_s23  ;;  %v669_v33 = vstv %s1236_s24 }
  0x49   :  { %v996_v34 = vrot.slane %v617_v28, 11  ;;  %v997_v35 = vrot.slane %v618_v29, 11  ;;  %v667_v36 = vmul.f32 %v666_v32, %v1077_v2  ;;  %v668_v37 = vmul.f32 %v666_v32, %v1082_v3 }
  0x4a   :  { %v670_v38 = vmul.f32 %v669_v33, %v1077_v2  ;;  %v671_v39 = vmul.f32 %v669_v33, %v1082_v3  ;;  %v682_v40 = vstv %s1240_s26  ;;  %v695_v41 = vstv %s1246_s27 }
  0x4b   :  { %v627_v42 = vadd.f32 %v996_v34, %v614_v30  ;;  %v628_v43 = vadd.f32 %v997_v35, %v615_v31  ;;  %v683_v44 = vmul.f32 %v682_v40, %v1077_v2  ;;  %v684_v45 = vmul.f32 %v682_v40, %v1082_v3 }
  0x4c   :  { %v998_v46 = vrot.slane %v670_v38, 9  ;;  %v999_v47 = vrot.slane %v671_v39, 9  ;;  %v696_v48 = vmul.f32 %v695_v41, %v1077_v2  ;;  %v697_v49 = vmul.f32 %v695_v41, %v1082_v3 }
  0x4d   :  { %v638_v50 = vrot.slane %v627_v42, %v1100_v15  ;;  %v646_v51 = vrot.slane %v628_v43, %v1100_v15  ;;  %v634_v52 = vrot.slane %v627_v42, %v1089_v5  ;;  %v642_v53 = vrot.slane %v628_v43, %v1089_v5 }
  0x4e   :  { %v680_v54 = vadd.f32 %v998_v46, %v667_v36  ;;  %v681_v55 = vadd.f32 %v999_v47, %v668_v37  ;;  %v1000_v56 = vrot.slane %v683_v44, 10  ;;  %v1001_v57 = vrot.slane %v684_v45, 10 }
  0x4f   :  { %v648_v58 = vsel %vm170_vm0, %v646_v51, %v638_v50  ;;  %v647_v59 = vsel %vm170_vm0, %v642_v53, %v634_v52  ;;  %v1002_v60 = vrot.slane %v696_v48, 11  ;;  %v1003_v61 = vrot.slane %v697_v49, 11 }
  0x50   :  { %653 = vrot.lane.b32.xlu1 %v648_v58, %s1044_s28  ;;  %651 = vrot.lane.b32.xlu0 %v647_v59, %s1044_s28  ;;  %v693_v62 = vadd.f32 %v1000_v56, %v680_v54  ;;  %v694_v63 = vadd.f32 %v1001_v57, %v681_v55  ;;  %v71_v13 = vstv %s920_s30  ;;  %v68_v16 = vstv %s29_s4 }
  0x51   :  { %v72_v14 = vmul.f32 %v71_v13, %v1077_v2  ;;  %v84_v17 = vstv %s929_s5  ;;  %v73_v18 = vmul.f32 %v71_v13, %v1082_v3  ;;  %v69_v19 = vmul.f32 %v68_v16, %v1077_v2 }
  0x52   :  { %v706_v4 = vadd.f32 %v1002_v60, %v693_v62  ;;  %v707_v6 = vadd.f32 %v1003_v61, %v694_v63  ;;  %v85_v21 = vmul.f32 %v84_v17, %v1077_v2  ;;  %v97_v22 = vstv %s938_s6 }
  0x53   :  { %v950_v20 = vrot.slane %v72_v14, 9  ;;  %v70_v23 = vmul.f32 %v68_v16, %v1082_v3  ;;  %v951_v24 = vrot.slane %v73_v18, 9  ;;  %v86_v25 = vmul.f32 %v84_v17, %v1082_v3 }
  0x54   :  { %v717_v7 = vrot.slane %v706_v4, %v1100_v15  ;;  %v725_v8 = vrot.slane %v707_v6, %v1100_v15  ;;  %v713_v9 = vrot.slane %v706_v4, %v1089_v5  ;;  %v721_v10 = vrot.slane %v707_v6, %v1089_v5 }
  0x55   :  { %v1291_v27 = vand.u32 127, %v154_v0  ;;  %v82_v28 = vadd.f32 %v950_v20, %v69_v19  ;;  %v952_v29 = vrot.slane %v85_v21, 10  ;;  %v98_v30 = vmul.f32 %v97_v22, %v1077_v2 }
  0x56   :  { %v727_v11 = vsel %vm170_vm0, %v725_v8, %v717_v7  ;;  %v726_v12 = vsel %vm170_vm0, %v721_v10, %v713_v9  ;;  %v83_v31 = vadd.f32 %v951_v24, %v70_v23  ;;  %v953_v32 = vrot.slane %v86_v25, 10 }
  0x57   :  { %732 = vrot.lane.b32.xlu1 %v727_v11, %s1045_s29  ;;  %730 = vrot.lane.b32.xlu0 %v726_v12, %s1045_s29  ;;  %v99_v33 = vmul.f32 %v97_v22, %v1082_v3  ;;  %vm260_vm1 = vcmp.lt.s32.totalorder %v1291_v27, 126  ;;  %v95_v36 = vadd.f32 %v952_v29, %v82_v28  ;;  %v954_v37 = vrot.slane %v98_v30, 11 }
  0x58   :  { %v96_v38 = vadd.f32 %v953_v32, %v83_v31  ;;  %vm181_vm2 = vcmp.lt.s32.totalorder %v1291_v27, 127  ;;  %vm339_vm3 = vcmp.lt.s32.totalorder %v1291_v27, 112  ;;  %vm418_vm4 = vcmp.lt.s32.totalorder %v1291_v27, 111 }
  0x59   :  { %v955_v39 = vrot.slane %v99_v33, 11  ;;  %v108_v42 = vadd.f32 %v954_v37, %v95_v36  ;;  %vm497_vm5 = vcmp.lt.s32.totalorder %v1291_v27, 110  ;;  %v745_v9 = vadd.s32 128, %v1291_v27 }
  0x5a   :  { %v746_v16 = vcvt.s32.f32 %v1291_v27  ;;  %vm576_vm6 = vcmp.lt.s32.totalorder %v1291_v27, 96  ;;  %vm655_vm7 = vcmp.lt.s32.totalorder %v1291_v27, 95  ;;  %vm734_vm8 = vcmp.lt.s32.totalorder %v1291_v27, 94 }
  0x5b   :  { %v109_v45 = vadd.f32 %v955_v39, %v96_v38  ;;  %v747_v17 = vcvt.s32.f32 %v745_v9 }
  0x5c   :  { %v748_v21 = vadd.f32 0.5, %v746_v16 }
  0x5d   :  { %v749_v24 = vadd.f32 0.5, %v747_v17 }
  0x5e   :  { %v750_v29 = vmul.f32 0.0625, %v748_v21 }
  0x5f   :  { %v751_v32 = vmul.f32 0.0625, %v749_v24 }
  0x61   :  { %v753_v37 = vfloor.f32 %v751_v32 }
  0x63   :  { %vm761_vm12 = vcmp.lt.f32.partialorder %v753_v37, 14.0 }
  0x96   :  { %v257_v26 = vpop.permute.xlu1 %256 }
  0x9a   :  { %v259_v35 = vpop.permute.xlu1 %258 }
  0x9b   :  { %v176_v34 = vpop.permute.xlu0 %175  ;;  %v261_v0 = vsel %vm260_vm1, %v257_v26, %v259_v35  ;;  %v262_v40 = vsel %vm260_vm1, %v259_v35, %v257_v26  ;;  %vm803_vm1 = vcmask 1043456  }
  0x9c   :  { %v265_v44 = vcombine.low %v261_v0, %v262_v40 }
  0x9e   :  { %v266_v48 = vrot.slane %v265_v44, 1 }
  0x9f   :  { %v178_v41 = vpop.permute.xlu0 %177 }
  0xa0   :  { %v182_v43 = vsel %vm181_vm2, %v176_v34, %v178_v41  ;;  %v183_v2 = vsel %vm181_vm2, %v178_v41, %v176_v34  ;;  %v752_v34 = vfloor.f32 %v750_v29  ;;  %vm809_vm2 = vcmask 1024  }
  0xa1   :  { %v186_v46 = vcombine.low %v182_v43, %v183_v2  ;;  %v755_v43 = vmul.f32 16.0, %v753_v37 }
  0xa2   :  { %v754_v40 = vmul.f32 16.0, %v752_v34  ;;  %vm760_vm10 = vcmp.lt.f32.partialorder %v752_v34, 14.0 }
  0xa3   :  { %v187_v3 = vrot.slane %v186_v46, 1  ;;  %v190_v47 = vadd.f32 %v186_v46, %v108_v42 }
  0xa4   :  { %v756_v46 = vsub.f32 %v746_v16, %v754_v40 }
  0xa5   :  { %v191_v49 = vadd.f32 %v187_v3, %v109_v45  ;;  %v338_v50 = vpop.permute.xlu1 %337  ;;  %v336_v51 = vpop.permute.xlu0 %335  ;;  %v269_v52 = vadd.f32 %v265_v44, %v190_v47 }
  0xa6   :  { %v340_v53 = vsel %vm339_vm3, %v336_v51, %v338_v50  ;;  %v341_v54 = vsel %vm339_vm3, %v338_v50, %v336_v51  ;;  %vm758_vm9 = vcmp.lt.f32.partialorder %v756_v46, 14.0 }
  0xa7   :  { %v270_v55 = vadd.f32 %v266_v48, %v191_v49  ;;  %v344_v56 = vcombine.low %v340_v53, %v341_v54  ;;  %v757_v48 = vsub.f32 %v747_v17, %v755_v43  ;;  %vm762_vm13 = vmand %vm758_vm9, %vm760_vm10 }
  0xa9   :  { %v345_v57 = vrot.slane %v344_v56, 1  ;;  %v348_v58 = vadd.f32 %v344_v56, %v269_v52  ;;  %vm759_vm11 = vcmp.lt.f32.partialorder %v757_v48, 14.0 }
  0xaa   :  { %vm763_vm14 = vmand %vm759_vm11, %vm761_vm12 }
  0xab   :  { %v349_v59 = vadd.f32 %v345_v57, %v270_v55  ;;  %v417_v60 = vpop.permute.xlu1 %416  ;;  %v415_v61 = vpop.permute.xlu0 %414 }
  0xac   :  { %v419_v62 = vsel %vm418_vm4, %v415_v61, %v417_v60  ;;  %v420_v63 = vsel %vm418_vm4, %v417_v60, %v415_v61 }
  0xad   :  { %v423_v4 = vcombine.low %v419_v62, %v420_v63 }
  0xaf   :  { %v424_v6 = vrot.slane %v423_v4, 1  ;;  %v427_v7 = vadd.f32 %v423_v4, %v348_v58 }
  0xb1   :  { %v428_v8 = vadd.f32 %v424_v6, %v349_v59 }
  0xb3   :  { %v496_v10 = vpop.permute.xlu1 %495  ;;  %v494_v11 = vpop.permute.xlu0 %493 }
  0xb4   :  { %v498_v12 = vsel %vm497_vm5, %v494_v11, %v496_v10  ;;  %v499_v13 = vsel %vm497_vm5, %v496_v10, %v494_v11 }
  0xb5   :  { %v502_v14 = vcombine.low %v498_v12, %v499_v13 }
  0xb7   :  { %v503_v18 = vrot.slane %v502_v14, 1  ;;  %v506_v19 = vadd.f32 %v502_v14, %v427_v7 }
  0xb9   :  { %v507_v20 = vadd.f32 %v503_v18, %v428_v8 }
  0xba   :  { %v575_v22 = vpop.permute.xlu1 %574  ;;  %v573_v23 = vpop.permute.xlu0 %572 }
  0xbb   :  { %v577_v25 = vsel %vm576_vm6, %v573_v23, %v575_v22  ;;  %v578_v26 = vsel %vm576_vm6, %v575_v22, %v573_v23 }
  0xbc   :  { %v581_v28 = vcombine.low %v577_v25, %v578_v26 }
  0xbe   :  { %v582_v30 = vrot.slane %v581_v28, 1  ;;  %v585_v31 = vadd.f32 %v581_v28, %v506_v19 }
  0xc0   :  { %v586_v33 = vadd.f32 %v582_v30, %v507_v20 }
  0xc2   :  { %v654_v35 = vpop.permute.xlu1 %653  ;;  %v652_v36 = vpop.permute.xlu0 %651 }
  0xc3   :  { %v656_v38 = vsel %vm655_vm7, %v652_v36, %v654_v35  ;;  %v657_v39 = vsel %vm655_vm7, %v654_v35, %v652_v36 }
  0xc4   :  { %v660_v0 = vcombine.low %v656_v38, %v657_v39  ;;  %v861_v38 = vsub.s32 1, %v1070_v1  ;;  %v853_v39 = vld [vmem:[%s1343_s1] sm:$0x3]  ;;  %s949_s1 = sld [smem:[#allocation2 + $0x27]] }
  0xc5   :  { %v858_v40 = vrot.slane %v853_v39, %v1089_v5 }
  0xc6   :  { %v661_v41 = vrot.slane %v660_v0, 1  ;;  %v664_v42 = vadd.f32 %v660_v0, %v585_v31  ;;  %v842_v0 = vstv %s947_s9 }
  0xc8   :  { %v665_v2 = vadd.f32 %v661_v41, %v586_v33  ;;  %v862_v41 = vrot.slane %v853_v39, %v861_v38 }
  0xc9   :  { %v733_v44 = vpop.permute.xlu1 %732  ;;  %v731_v45 = vpop.permute.xlu0 %730 }
  0xca   :  { %v735_v3 = vsel %vm734_vm8, %v731_v45, %v733_v44  ;;  %v736_v47 = vsel %vm734_vm8, %v733_v44, %v731_v45  ;;  %v863_v45 = vcombine.low %v858_v40, %v862_v41 }
  0xcb   :  { %v739_v49 = vcombine.low %v735_v3, %v736_v47 }
  0xcd   :  { %v740_v50 = vrot.slane %v739_v49, 1  ;;  %v1305_v51 = vadd.f32 %v739_v49, %v664_v42  ;;  %v864_v49 = vrot.slane %v863_v45, 1 }
  0xcf   :  { %v1307_v52 = vadd.f32 %v740_v50, %v665_v2  ;;  %v773_v27 = vrot.slane %v1305_v51, %v1089_v5  ;;  %v777_v53 = vrot.slane %v1305_v51, %v1100_v15  ;;  %v845_v2 = vstv %s948_s10 }
  0xd1   :  { %v781_v54 = vrot.slane %v1307_v52, %v1089_v5  ;;  %v785_v55 = vrot.slane %v1307_v52, %v1100_v15 }
  0xd3   :  { %v786_v56 = vsel %vm170_vm0, %v781_v54, %v773_v27  ;;  %v787_v57 = vsel %vm170_vm0, %v785_v55, %v777_v53 }
  0xd4   :  { %v790_v58 = vsel %vm762_vm13, %v786_v56, 0.0  ;;  %v791_v59 = vsel %vm763_vm14, %v787_v57, 0.0 }
  0xd5   :  { %v792_v60 = vmul.f32 %v790_v58, %v790_v58  ;;  %v793_v61 = vmul.f32 %v791_v59, %v791_v59 }
  0xd7   :  { %v796_v62 = vrot.slane %v792_v60, 6  ;;  %v797_v63 = vrot.slane %v793_v61, 6 }
  0xd9   :  { %v801_v4 = vsel %vm800_vm15, %v790_v58, %v796_v62  ;;  %v802_v6 = vsel %vm800_vm15, %v791_v59, %v797_v63  ;;  %v896_v62 = vstv %s949_s1 }
  0xda   :  { %v804_v7 = vsel %vm803_vm1, %v801_v4, 0.0  ;;  %v805_v8 = vsel %vm803_vm1, %v802_v6, 0.0 }
  0xdb   :  { %v806_v9 = vadd.f32 %v805_v8, %v804_v7 }
  0xdd   :  { %807 = vadd.xlane.f32.xlu0 %v806_v9 }
 0x166   :  { %v808_v10 = vpop.xlane.xlu0 %807 }
 0x167   :  { %v823_v11 = vrot.slane %v808_v10, 2  ;;  %v810_v12 = vsel %vm809_vm2, %v808_v10, 0.0 }
 0x168   :  { %811 = vadd.xlane.f32.xlu1 %v810_v12 }
 0x169   :  { %v825_v13 = vsel %vm809_vm2, %v823_v11, 0.0 }
 0x16a   :  { %826 = vadd.xlane.f32.xlu0 %v825_v13 }
 0x1f1   :  { %v812_v14 = vpop.xlane.xlu1 %811 }
 0x1f2   :  { %v813_v16 = vrot.slane %v812_v14, 4 }
 0x1f3   :  { %v827_v17 = vpop.xlane.xlu0 %826 }
 0x1f4   :  { %v814_v18 = vadd.f32 %v813_v16, %v812_v14  ;;  %v828_v19 = vrot.slane %v827_v17, 4 }
 0x1f6   :  { %v815_v20 = vrot.slane %v814_v18, 2  ;;  %v829_v21 = vadd.f32 %v828_v19, %v827_v17 }
 0x1f8   :  { %v830_v22 = vrot.slane %v829_v21, 2  ;;  %v816_v23 = vadd.f32 %v815_v20, %v814_v18 }
 0x1fa   :  { %v817_v24 = vrot.slane %v816_v23, 1  ;;  %v831_v25 = vadd.f32 %v830_v22, %v829_v21 }
 0x1fc   :  { %v818_v26 = vadd.f32 %v817_v24, %v816_v23  ;;  %v832_v28 = vrot.slane %v831_v25, 1 }
 0x1fe   :  { %1004 = vpush %v818_v26  ;;  %v833_v29 = vadd.f32 %v832_v28, %v831_v25 }
 0x200   :  { %1006 = vpush %v833_v29 }
 0x22f   :  { %s1005_s7 = spop %1004 }
 0x230   :  { %v820_v30 = vstv %s1005_s7 }
 0x231   :  { %v821_v31 = vmul.f32 0.0025510204, %v820_v30  ;;  %s1007_s8 = spop %1006 }
 0x232   :  { %v835_v32 = vstv %s1007_s8 }
 0x233   :  { %v837_v33 = vmul.f32 %v821_v31, %v821_v31  ;;  %v836_v34 = vmul.f32 0.0025510204, %v835_v32 }
 0x235   :  { %v838_v35 = vsub.f32 %v836_v34, %v837_v33 }
 0x237   :  { %v839_v36 = vmax.f32 %v838_v35, 0.0 }
 0x239   :  { %v840_v37 = vadd.f32 2e-05, %v839_v36 }
 0x23b   :  { %1017 = vrsqrt.f32 %v840_v37 }
 0x248   :  { %v1018_v42 = vpop.eup %1017 }
 0x249   :  { %v843_v43 = vmul.f32 %v1018_v42, %v842_v0 }
 0x24b   :  { %v844_v44 = vmul.f32 %v843_v43, %v821_v31  ;;  %v847_v3 = vmul.f32 %v843_v43, %v1305_v51  ;;  %v848_v47 = vmul.f32 %v843_v43, %v1307_v52 }
 0x24d   :  { %v846_v46 = vsub.f32 %v845_v2, %v844_v44 }
 0x24f   :  { %v849_v48 = vadd.f32 %v847_v3, %v846_v46  ;;  %v850_v1 = vadd.f32 %v848_v47, %v846_v46 }
 0x251   :  { %v851_v50 = vmax.f32 %v849_v48, 0.0  ;;  %v852_v27 = vmax.f32 %v850_v1, 0.0 }
 0x253   :  { %v867_v53 = vmul.f32 %v863_v45, %v851_v50  ;;  %v868_v54 = vmul.f32 %v864_v49, %v852_v27 }
 0x255   :  { %v874_v55 = vrot.slane %v867_v53, %v1089_v5  ;;  %v878_v56 = vrot.slane %v867_v53, %v1100_v15  ;;  %v882_v57 = vrot.slane %v868_v54, %v1089_v5  ;;  %v886_v58 = vrot.slane %v868_v54, %v1100_v15 }
 0x257   :  { %v887_v59 = vsel %vm170_vm0, %v882_v57, %v874_v55  ;;  %v888_v51 = vsel %vm170_vm0, %v886_v58, %v878_v56 }
 0x258   :  { %v891_v52 = vsel %vm800_vm15, %v887_v59, 0.0  ;;  %v892_v60 = vsel %vm800_vm15, %v888_v51, 0.0 }
 0x259   :  { %v893_v61 = vadd.f32 %v892_v60, %v891_v52 }
 0x25b   :  { %894 = vadd.xlane.f32.xlu0 %v893_v61 }
 0x2e4   :  { %v895_v63 = vpop.xlane.xlu0 %894 }
 0x2e5   :  { %v897_v4 = vadd.f32 %v896_v62, %v895_v63 }
 0x2e7   :  { %v899_v6 = vmin.f32 %v897_v4, 20.0  ;;  %vm898_vm3 = vcmp.gt.f32.partialorder %v897_v4, 20.0 }
 0x2e9   :  { %v900_v7 = vmul.f32 1.442695, %v899_v6 }
 0x2eb   :  { %1019 = vpow2.f32 %v900_v7 }
 0x2f8   :  { %v1020_v5 = vpop.eup %1019 }
 0x2f9   :  { %v902_v8 = vadd.f32 1.0, %v1020_v5 }
 0x2fb   :  { %1021 = vlog2.f32 %v902_v8 }
 0x308   :  { %v1022_v15 = vpop.eup %1021 }
 0x309   :  { %v904_v9 = vmul.f32 0.6931472, %v1022_v15 }
 0x30b   :  { %v905_v10 = vsel %vm898_vm3, %v897_v4, %v904_v9 }
 0x30c   :  { %906 = vst.msk [vmem:[%s1345_s3] sm:$0x3] %vm809_vm2, %v905_v10 }
 0x30d   :  { %911 = vsyncpa [#allocation3], 1 }

</bundles_post_ra>
